<compile_context>
chip_gen: v7x
topology: tpu7x:2x2x1
jax: 0.10.0
libtpu: 0.0.40
codegen_flags: <defaults>
</compile_context>

<pallas_src>
import math

import jax
import jax.numpy as jnp
from jax.experimental import pallas as pl
from jax.experimental.pallas import tpu as pltpu


def mha_kernel(q_in_ref, k_in_ref, v_in_ref,
               wq_ref, wk_ref, wv_ref, wo_ref,
               ln_g_ref, ln_b_ref,
               out_ref, scores_ref):
    # q_in_ref/k_in_ref/v_in_ref : (1, S, D)      per-batch input block
    # wq_ref/wk_ref              : (D, H*DK)      resident weights (x @ W layout)
    # wv_ref                     : (D, H*DV)
    # wo_ref                     : (H*DV, D)
    # ln_g_ref / ln_b_ref        : (1, D)
    # out_ref                    : (1, S, D)
    # scores_ref                 : (1, H, S, S)
    S = q_in_ref.shape[1]
    D = q_in_ref.shape[2]
    H = scores_ref.shape[1]
    DK = wq_ref.shape[1] // H
    DV = wv_ref.shape[1] // H
    inv_sqrt_dk = 1.0 / math.sqrt(DK)

    xq = q_in_ref[0, :, :]                     # (S, D)  also the residual
    xk = k_in_ref[0, :, :]
    xv = v_in_ref[0, :, :]

    # Linear projections (no bias) on the MXU.
    Q = jnp.dot(xq, wq_ref[...], preferred_element_type=jnp.float32)   # (S, H*DK)
    K = jnp.dot(xk, wk_ref[...], preferred_element_type=jnp.float32)   # (S, H*DK)
    V = jnp.dot(xv, wv_ref[...], preferred_element_type=jnp.float32)   # (S, H*DV)
    WO = wo_ref[...]                                                    # (H*DV, D)

    # Per-head attention; accumulate the output projection head-by-head so no
    # (S, H*DV) concat buffer is needed.
    o = jnp.zeros((S, D), dtype=jnp.float32)
    for h in range(H):                          # H is static -> unrolled
        Qh = Q[:, h * DK:(h + 1) * DK]          # (S, DK)
        Kh = K[:, h * DK:(h + 1) * DK]          # (S, DK)
        Vh = V[:, h * DV:(h + 1) * DV]          # (S, DV)

        s = jnp.dot(Qh, Kh.T, preferred_element_type=jnp.float32) * inv_sqrt_dk  # (S, S)

        # Numerically-stable softmax along the last axis.
        m = jnp.max(s, axis=-1, keepdims=True)
        e = jnp.exp(s - m)
        p = e / jnp.sum(e, axis=-1, keepdims=True)                      # (S, S)
        scores_ref[0, h, :, :] = p

        ctx_h = jnp.dot(p, Vh, preferred_element_type=jnp.float32)      # (S, DV)
        o = o + jnp.dot(ctx_h, WO[h * DV:(h + 1) * DV, :],
                        preferred_element_type=jnp.float32)             # (S, D)

    # Residual add + LayerNorm (eps = 1e-5), fused into per-row scale/shift.
    y = o + xq
    mean = jnp.mean(y, axis=-1, keepdims=True)                          # (S, 1)
    var = jnp.mean((y - mean) ** 2, axis=-1, keepdims=True)             # (S, 1)
    inv = jax.lax.rsqrt(var + 1e-5)                                     # (S, 1)
    scale = ln_g_ref[...] * inv                                         # (S, D)
    shift = ln_b_ref[...] - mean * scale                                # (S, D)
    out_ref[0, :, :] = y * scale + shift


def multi_headed_attention_forward(input_Q, input_K, input_V,
                                   W_Q, W_K, W_V, W_out,
                                   ln_gamma, ln_beta,
                                   *, n_heads, mask=None):
    """Pallas forward matching MultiHeadedAttention.forward (mask=None path).

    input_Q/K/V : (B, S, d_model) float32
    W_Q/W_K/W_V : (n_heads*d_k, d_model)   -- PyTorch nn.Linear weight layout
    W_out       : (d_model, n_heads*d_v)
    ln_gamma/ln_beta : (d_model,)
    Returns (out, scores) with out (B, S, d_model), scores (B, n_heads, S, S).
    """
    if mask is not None:
        # TODO(synk): masked attention not implemented in the Pallas kernel.
        raise NotImplementedError("mask is not supported in the Pallas kernel")

    B, S, D = input_Q.shape
    H = n_heads
    HDK = W_Q.shape[0]
    HDV = W_V.shape[0]

    # Pre-transpose Linear weights once (glue) so the kernel does x @ W.
    wq_t = W_Q.T            # (D, H*DK)
    wk_t = W_K.T            # (D, H*DK)
    wv_t = W_V.T            # (D, H*DV)
    wo_t = W_out.T          # (H*DV, D)
    g2 = ln_gamma.reshape(1, D)
    b2 = ln_beta.reshape(1, D)

    const = lambda b: (0, 0)
    out, scores = pl.pallas_call(
        mha_kernel,
        out_shape=(
            jax.ShapeDtypeStruct((B, S, D), jnp.float32),
            jax.ShapeDtypeStruct((B, H, S, S), jnp.float32),
        ),
        grid=(B,),
        in_specs=[
            pl.BlockSpec((1, S, D), lambda b: (b, 0, 0)),   # input_Q (per-batch)
            pl.BlockSpec((1, S, D), lambda b: (b, 0, 0)),   # input_K
            pl.BlockSpec((1, S, D), lambda b: (b, 0, 0)),   # input_V
            pl.BlockSpec((D, HDK), const),                  # W_Q^T (resident)
            pl.BlockSpec((D, HDK), const),                  # W_K^T
            pl.BlockSpec((D, HDV), const),                  # W_V^T
            pl.BlockSpec((HDV, D), const),                  # W_out^T
            pl.BlockSpec((1, D), const),                    # ln gamma
            pl.BlockSpec((1, D), const),                    # ln beta
        ],
        out_specs=(
            pl.BlockSpec((1, S, D), lambda b: (b, 0, 0)),
            pl.BlockSpec((1, H, S, S), lambda b: (b, 0, 0, 0)),
        ),
        compiler_params=pltpu.CompilerParams(
            dimension_semantics=("parallel",)),
    )(input_Q, input_K, input_V, wq_t, wk_t, wv_t, wo_t, g2, b2)
    return out, scores


def reference_forward(input_Q, input_K, input_V, W_Q, W_K, W_V, W_out,
                      ln_gamma, ln_beta, *, n_heads, d_k, d_v):
    """Pure-JAX reference mirroring the PyTorch module (mask=None)."""
    B, S, D = input_Q.shape
    H = n_heads
    Q = (input_Q @ W_Q.T).reshape(B, S, H, d_k).transpose(0, 2, 1, 3)
    K = (input_K @ W_K.T).reshape(B, S, H, d_k).transpose(0, 2, 1, 3)
    V = (input_V @ W_V.T).reshape(B, S, H, d_v).transpose(0, 2, 1, 3)
    scores = jnp.einsum("bhqd,bhkd->bhqk", Q, K) / math.sqrt(d_k)
    scores = jax.nn.softmax(scores, axis=-1)
    context = jnp.einsum("bhqk,bhkd->bhqd", scores, V)
    context = context.transpose(0, 2, 1, 3).reshape(B, S, H * d_v)
    context = context @ W_out.T
    y = context + input_Q
    mean = jnp.mean(y, axis=-1, keepdims=True)
    var = jnp.mean((y - mean) ** 2, axis=-1, keepdims=True)
    out = (y - mean) * jax.lax.rsqrt(var + 1e-5) * ln_gamma + ln_beta
    return out, scores


if __name__ == "__main__":
    # Small shapes consistent with the module: batch=2, seq=8, d_model=32,
    # n_heads=4, d_k=d_v=8.
    B, S, D = 2, 8, 32
    H, DK, DV = 4, 8, 8

    key = jax.random.PRNGKey(0)
    kx, kq, kk, kv, ko = jax.random.split(key, 5)

    x = jax.random.normal(kx, (B, S, D), dtype=jnp.float32)

    def xavier_uniform(k, shape):
        fan_out, fan_in = shape
        bound = math.sqrt(6.0 / (fan_in + fan_out))
        return jax.random.uniform(k, shape, minval=-bound, maxval=bound,
                                  dtype=jnp.float32)

    # nn.Linear weights in PyTorch layout (out_features, in_features), no bias.
    W_Q = xavier_uniform(kq, (H * DK, D))
    W_K = xavier_uniform(kk, (H * DK, D))
    W_V = xavier_uniform(kv, (H * DV, D))
    W_out = xavier_uniform(ko, (D, H * DV))
    # LayerNorm default init.
    ln_gamma = jnp.ones((D,), dtype=jnp.float32)
    ln_beta = jnp.zeros((D,), dtype=jnp.float32)

    out, scores = multi_headed_attention_forward(
        x, x, x, W_Q, W_K, W_V, W_out, ln_gamma, ln_beta, n_heads=H)
    out = jax.block_until_ready(out)
    scores = jax.block_until_ready(scores)

    ref_out, ref_scores = reference_forward(
        x, x, x, W_Q, W_K, W_V, W_out, ln_gamma, ln_beta,
        n_heads=H, d_k=DK, d_v=DV)

    assert out.shape == (B, S, D), out.shape
    assert scores.shape == (B, H, S, S), scores.shape
    assert jnp.allclose(out, ref_out, atol=1e-4, rtol=1e-4), \
        float(jnp.max(jnp.abs(out - ref_out)))
    assert jnp.allclose(scores, ref_scores, atol=1e-4, rtol=1e-4), \
        float(jnp.max(jnp.abs(scores - ref_scores)))

    print("KERNEL_OK")
</pallas_src>

<mosaic_0001>
module attributes {stable_mosaic.version = 11 : i64} {
  func.func @mha_kernel(%arg0: i32, %arg1: memref<1x8x32xf32, #tpu.memory_space<vmem>>, %arg2: memref<1x8x32xf32, #tpu.memory_space<vmem>>, %arg3: memref<1x8x32xf32, #tpu.memory_space<vmem>>, %arg4: memref<32x32xf32, #tpu.memory_space<vmem>>, %arg5: memref<32x32xf32, #tpu.memory_space<vmem>>, %arg6: memref<32x32xf32, #tpu.memory_space<vmem>>, %arg7: memref<32x32xf32, #tpu.memory_space<vmem>>, %arg8: memref<1x32xf32, #tpu.memory_space<vmem>>, %arg9: memref<1x32xf32, #tpu.memory_space<vmem>>, %arg10: memref<1x8x32xf32, #tpu.memory_space<vmem>>, %arg11: memref<1x4x8x8xf32, #tpu.memory_space<vmem>>) attributes {dimension_semantics = [#tpu.dimension_semantics<parallel>], iteration_bounds = array<i64: 2>, scalar_prefetch = 0 : i64, scratch_operands = 0 : i64, tpu.core_type = #tpu.core_type<tc>, window_params = [{transform_indices = @transform_0, window_bounds = array<i64: 1, 8, 32>}, {transform_indices = @transform_1, window_bounds = array<i64: 1, 8, 32>}, {transform_indices = @transform_2, window_bounds = array<i64: 1, 8, 32>}, {pipeline_mode = #tpu.pipeline_mode<synchronous>, transform_indices = @transform_3, window_bounds = array<i64: 32, 32>}, {pipeline_mode = #tpu.pipeline_mode<synchronous>, transform_indices = @transform_4, window_bounds = array<i64: 32, 32>}, {pipeline_mode = #tpu.pipeline_mode<synchronous>, transform_indices = @transform_5, window_bounds = array<i64: 32, 32>}, {pipeline_mode = #tpu.pipeline_mode<synchronous>, transform_indices = @transform_6, window_bounds = array<i64: 32, 32>}, {pipeline_mode = #tpu.pipeline_mode<synchronous>, transform_indices = @transform_7, window_bounds = array<i64: 1, 32>}, {pipeline_mode = #tpu.pipeline_mode<synchronous>, transform_indices = @transform_8, window_bounds = array<i64: 1, 32>}, {transform_indices = @transform_9, window_bounds = array<i64: 1, 8, 32>}, {transform_indices = @transform_10, window_bounds = array<i64: 1, 4, 8, 8>}]} {
    %c0 = arith.constant 0 : index
    %c0_0 = arith.constant 0 : index
    %c0_1 = arith.constant 0 : index
    %0 = vector.load %arg1[%c0, %c0_0, %c0_1] : memref<1x8x32xf32, #tpu.memory_space<vmem>>, vector<1x8x32xf32>
    %1 = vector.shape_cast %0 : vector<1x8x32xf32> to vector<8x32xf32>
    %c0_2 = arith.constant 0 : index
    %c0_3 = arith.constant 0 : index
    %c0_4 = arith.constant 0 : index
    %2 = vector.load %arg2[%c0_2, %c0_3, %c0_4] : memref<1x8x32xf32, #tpu.memory_space<vmem>>, vector<1x8x32xf32>
    %3 = vector.shape_cast %2 : vector<1x8x32xf32> to vector<8x32xf32>
    %c0_5 = arith.constant 0 : index
    %c0_6 = arith.constant 0 : index
    %c0_7 = arith.constant 0 : index
    %4 = vector.load %arg3[%c0_5, %c0_6, %c0_7] : memref<1x8x32xf32, #tpu.memory_space<vmem>>, vector<1x8x32xf32>
    %5 = vector.shape_cast %4 : vector<1x8x32xf32> to vector<8x32xf32>
    %c0_8 = arith.constant 0 : index
    %c0_9 = arith.constant 0 : index
    %6 = vector.load %arg4[%c0_8, %c0_9] : memref<32x32xf32, #tpu.memory_space<vmem>>, vector<32x32xf32>
    %cst = arith.constant dense<0.000000e+00> : vector<8x32xf32>
    %7 = tpu.matmul %1, %6, %cst {dimension_numbers = #tpu.dot_dimension_numbers<[1], [0], [0], [1], [0, 0, 1, 1], [], []>} : vector<8x32xf32>, vector<32x32xf32>, vector<8x32xf32> -> vector<8x32xf32>
    %c0_10 = arith.constant 0 : index
    %c0_11 = arith.constant 0 : index
    %8 = vector.load %arg5[%c0_10, %c0_11] : memref<32x32xf32, #tpu.memory_space<vmem>>, vector<32x32xf32>
    %cst_12 = arith.constant dense<0.000000e+00> : vector<8x32xf32>
    %9 = tpu.matmul %3, %8, %cst_12 {dimension_numbers = #tpu.dot_dimension_numbers<[1], [0], [0], [1], [0, 0, 1, 1], [], []>} : vector<8x32xf32>, vector<32x32xf32>, vector<8x32xf32> -> vector<8x32xf32>
    %c0_13 = arith.constant 0 : index
    %c0_14 = arith.constant 0 : index
    %10 = vector.load %arg6[%c0_13, %c0_14] : memref<32x32xf32, #tpu.memory_space<vmem>>, vector<32x32xf32>
    %cst_15 = arith.constant dense<0.000000e+00> : vector<8x32xf32>
    %11 = tpu.matmul %5, %10, %cst_15 {dimension_numbers = #tpu.dot_dimension_numbers<[1], [0], [0], [1], [0, 0, 1, 1], [], []>} : vector<8x32xf32>, vector<32x32xf32>, vector<8x32xf32> -> vector<8x32xf32>
    %c0_16 = arith.constant 0 : index
    %c0_17 = arith.constant 0 : index
    %12 = vector.load %arg7[%c0_16, %c0_17] : memref<32x32xf32, #tpu.memory_space<vmem>>, vector<32x32xf32>
    %cst_18 = arith.constant 0.000000e+00 : f32
    %13 = vector.broadcast %cst_18 : f32 to vector<8x32xf32>
    %14 = vector.extract_strided_slice %7 {offsets = [0, 0], sizes = [8, 8], strides = [1, 1]} : vector<8x32xf32> to vector<8x8xf32>
    %15 = vector.extract_strided_slice %9 {offsets = [0, 0], sizes = [8, 8], strides = [1, 1]} : vector<8x32xf32> to vector<8x8xf32>
    %16 = vector.extract_strided_slice %11 {offsets = [0, 0], sizes = [8, 8], strides = [1, 1]} : vector<8x32xf32> to vector<8x8xf32>
    %17 = tpu.transpose %15, [1, 0] : vector<8x8xf32> -> vector<8x8xf32>
    %cst_19 = arith.constant dense<0.000000e+00> : vector<8x8xf32>
    %18 = tpu.matmul %14, %17, %cst_19 {dimension_numbers = #tpu.dot_dimension_numbers<[1], [0], [0], [1], [0, 0, 1, 1], [], []>} : vector<8x8xf32>, vector<8x8xf32>, vector<8x8xf32> -> vector<8x8xf32>
    %cst_20 = arith.constant 0.353553385 : f32
    %19 = vector.broadcast %cst_20 : f32 to vector<8x8xf32>
    %20 = arith.mulf %18, %19 : vector<8x8xf32>
    %cst_21 = arith.constant dense<0xFF800000> : vector<8xf32>
    %21 = vector.multi_reduction <maximumf>, %20, %cst_21 [1] : vector<8x8xf32> to vector<8xf32>
    %22 = vector.shape_cast %21 : vector<8xf32> to vector<8x1xf32>
    %23 = vector.broadcast %22 : vector<8x1xf32> to vector<8x8xf32>
    %24 = arith.subf %20, %23 : vector<8x8xf32>
    %25 = math.exp %24 : vector<8x8xf32>
    %cst_22 = arith.constant dense<0.000000e+00> : vector<8xf32>
    %26 = vector.multi_reduction <add>, %25, %cst_22 [1] : vector<8x8xf32> to vector<8xf32>
    %27 = vector.shape_cast %26 : vector<8xf32> to vector<8x1xf32>
    %28 = vector.broadcast %27 : vector<8x1xf32> to vector<8x8xf32>
    %29 = arith.divf %25, %28 : vector<8x8xf32>
    %c0_23 = arith.constant 0 : index
    %c0_24 = arith.constant 0 : index
    %c0_25 = arith.constant 0 : index
    %c0_26 = arith.constant 0 : index
    %30 = vector.load %arg11[%c0_23, %c0_24, %c0_25, %c0_26] : memref<1x4x8x8xf32, #tpu.memory_space<vmem>>, vector<1x1x8x8xf32>
    %31 = vector.shape_cast %30 : vector<1x1x8x8xf32> to vector<8x8xf32>
    %32 = vector.shape_cast %29 : vector<8x8xf32> to vector<1x1x8x8xf32>
    tpu.vector_store %arg11[%c0_23, %c0_24, %c0_25, %c0_26], %32 {strides = array<i32>} : memref<1x4x8x8xf32, #tpu.memory_space<vmem>>, vector<1x1x8x8xf32>,
    %cst_27 = arith.constant dense<0.000000e+00> : vector<8x8xf32>
    %33 = tpu.matmul %29, %16, %cst_27 {dimension_numbers = #tpu.dot_dimension_numbers<[1], [0], [0], [1], [0, 0, 1, 1], [], []>} : vector<8x8xf32>, vector<8x8xf32>, vector<8x8xf32> -> vector<8x8xf32>
    %34 = vector.extract_strided_slice %12 {offsets = [0, 0], sizes = [8, 32], strides = [1, 1]} : vector<32x32xf32> to vector<8x32xf32>
    %cst_28 = arith.constant dense<0.000000e+00> : vector<8x32xf32>
    %35 = tpu.matmul %33, %34, %cst_28 {dimension_numbers = #tpu.dot_dimension_numbers<[1], [0], [0], [1], [0, 0, 1, 1], [], []>} : vector<8x8xf32>, vector<8x32xf32>, vector<8x32xf32> -> vector<8x32xf32>
    %36 = arith.addf %13, %35 : vector<8x32xf32>
    %37 = vector.extract_strided_slice %7 {offsets = [0, 8], sizes = [8, 8], strides = [1, 1]} : vector<8x32xf32> to vector<8x8xf32>
    %38 = vector.extract_strided_slice %9 {offsets = [0, 8], sizes = [8, 8], strides = [1, 1]} : vector<8x32xf32> to vector<8x8xf32>
    %39 = vector.extract_strided_slice %11 {offsets = [0, 8], sizes = [8, 8], strides = [1, 1]} : vector<8x32xf32> to vector<8x8xf32>
    %40 = tpu.transpose %38, [1, 0] : vector<8x8xf32> -> vector<8x8xf32>
    %cst_29 = arith.constant dense<0.000000e+00> : vector<8x8xf32>
    %41 = tpu.matmul %37, %40, %cst_29 {dimension_numbers = #tpu.dot_dimension_numbers<[1], [0], [0], [1], [0, 0, 1, 1], [], []>} : vector<8x8xf32>, vector<8x8xf32>, vector<8x8xf32> -> vector<8x8xf32>
    %cst_30 = arith.constant 0.353553385 : f32
    %42 = vector.broadcast %cst_30 : f32 to vector<8x8xf32>
    %43 = arith.mulf %41, %42 : vector<8x8xf32>
    %cst_31 = arith.constant dense<0xFF800000> : vector<8xf32>
    %44 = vector.multi_reduction <maximumf>, %43, %cst_31 [1] : vector<8x8xf32> to vector<8xf32>
    %45 = vector.shape_cast %44 : vector<8xf32> to vector<8x1xf32>
    %46 = vector.broadcast %45 : vector<8x1xf32> to vector<8x8xf32>
    %47 = arith.subf %43, %46 : vector<8x8xf32>
    %48 = math.exp %47 : vector<8x8xf32>
    %cst_32 = arith.constant dense<0.000000e+00> : vector<8xf32>
    %49 = vector.multi_reduction <add>, %48, %cst_32 [1] : vector<8x8xf32> to vector<8xf32>
    %50 = vector.shape_cast %49 : vector<8xf32> to vector<8x1xf32>
    %51 = vector.broadcast %50 : vector<8x1xf32> to vector<8x8xf32>
    %52 = arith.divf %48, %51 : vector<8x8xf32>
    %c0_33 = arith.constant 0 : index
    %c1 = arith.constant 1 : index
    %c0_34 = arith.constant 0 : index
    %c0_35 = arith.constant 0 : index
    %53 = vector.load %arg11[%c0_33, %c1, %c0_34, %c0_35] : memref<1x4x8x8xf32, #tpu.memory_space<vmem>>, vector<1x1x8x8xf32>
    %54 = vector.shape_cast %53 : vector<1x1x8x8xf32> to vector<8x8xf32>
    %55 = vector.shape_cast %52 : vector<8x8xf32> to vector<1x1x8x8xf32>
    tpu.vector_store %arg11[%c0_33, %c1, %c0_34, %c0_35], %55 {strides = array<i32>} : memref<1x4x8x8xf32, #tpu.memory_space<vmem>>, vector<1x1x8x8xf32>,
    %cst_36 = arith.constant dense<0.000000e+00> : vector<8x8xf32>
    %56 = tpu.matmul %52, %39, %cst_36 {dimension_numbers = #tpu.dot_dimension_numbers<[1], [0], [0], [1], [0, 0, 1, 1], [], []>} : vector<8x8xf32>, vector<8x8xf32>, vector<8x8xf32> -> vector<8x8xf32>
    %57 = vector.extract_strided_slice %12 {offsets = [8, 0], sizes = [8, 32], strides = [1, 1]} : vector<32x32xf32> to vector<8x32xf32>
    %cst_37 = arith.constant dense<0.000000e+00> : vector<8x32xf32>
    %58 = tpu.matmul %56, %57, %cst_37 {dimension_numbers = #tpu.dot_dimension_numbers<[1], [0], [0], [1], [0, 0, 1, 1], [], []>} : vector<8x8xf32>, vector<8x32xf32>, vector<8x32xf32> -> vector<8x32xf32>
    %59 = arith.addf %36, %58 : vector<8x32xf32>
    %60 = vector.extract_strided_slice %7 {offsets = [0, 16], sizes = [8, 8], strides = [1, 1]} : vector<8x32xf32> to vector<8x8xf32>
    %61 = vector.extract_strided_slice %9 {offsets = [0, 16], sizes = [8, 8], strides = [1, 1]} : vector<8x32xf32> to vector<8x8xf32>
    %62 = vector.extract_strided_slice %11 {offsets = [0, 16], sizes = [8, 8], strides = [1, 1]} : vector<8x32xf32> to vector<8x8xf32>
    %63 = tpu.transpose %61, [1, 0] : vector<8x8xf32> -> vector<8x8xf32>
    %cst_38 = arith.constant dense<0.000000e+00> : vector<8x8xf32>
    %64 = tpu.matmul %60, %63, %cst_38 {dimension_numbers = #tpu.dot_dimension_numbers<[1], [0], [0], [1], [0, 0, 1, 1], [], []>} : vector<8x8xf32>, vector<8x8xf32>, vector<8x8xf32> -> vector<8x8xf32>
    %cst_39 = arith.constant 0.353553385 : f32
    %65 = vector.broadcast %cst_39 : f32 to vector<8x8xf32>
    %66 = arith.mulf %64, %65 : vector<8x8xf32>
    %cst_40 = arith.constant dense<0xFF800000> : vector<8xf32>
    %67 = vector.multi_reduction <maximumf>, %66, %cst_40 [1] : vector<8x8xf32> to vector<8xf32>
    %68 = vector.shape_cast %67 : vector<8xf32> to vector<8x1xf32>
    %69 = vector.broadcast %68 : vector<8x1xf32> to vector<8x8xf32>
    %70 = arith.subf %66, %69 : vector<8x8xf32>
    %71 = math.exp %70 : vector<8x8xf32>
    %cst_41 = arith.constant dense<0.000000e+00> : vector<8xf32>
    %72 = vector.multi_reduction <add>, %71, %cst_41 [1] : vector<8x8xf32> to vector<8xf32>
    %73 = vector.shape_cast %72 : vector<8xf32> to vector<8x1xf32>
    %74 = vector.broadcast %73 : vector<8x1xf32> to vector<8x8xf32>
    %75 = arith.divf %71, %74 : vector<8x8xf32>
    %c0_42 = arith.constant 0 : index
    %c2 = arith.constant 2 : index
    %c0_43 = arith.constant 0 : index
    %c0_44 = arith.constant 0 : index
    %76 = vector.load %arg11[%c0_42, %c2, %c0_43, %c0_44] : memref<1x4x8x8xf32, #tpu.memory_space<vmem>>, vector<1x1x8x8xf32>
    %77 = vector.shape_cast %76 : vector<1x1x8x8xf32> to vector<8x8xf32>
    %78 = vector.shape_cast %75 : vector<8x8xf32> to vector<1x1x8x8xf32>
    tpu.vector_store %arg11[%c0_42, %c2, %c0_43, %c0_44], %78 {strides = array<i32>} : memref<1x4x8x8xf32, #tpu.memory_space<vmem>>, vector<1x1x8x8xf32>,
    %cst_45 = arith.constant dense<0.000000e+00> : vector<8x8xf32>
    %79 = tpu.matmul %75, %62, %cst_45 {dimension_numbers = #tpu.dot_dimension_numbers<[1], [0], [0], [1], [0, 0, 1, 1], [], []>} : vector<8x8xf32>, vector<8x8xf32>, vector<8x8xf32> -> vector<8x8xf32>
    %80 = vector.extract_strided_slice %12 {offsets = [16, 0], sizes = [8, 32], strides = [1, 1]} : vector<32x32xf32> to vector<8x32xf32>
    %cst_46 = arith.constant dense<0.000000e+00> : vector<8x32xf32>
    %81 = tpu.matmul %79, %80, %cst_46 {dimension_numbers = #tpu.dot_dimension_numbers<[1], [0], [0], [1], [0, 0, 1, 1], [], []>} : vector<8x8xf32>, vector<8x32xf32>, vector<8x32xf32> -> vector<8x32xf32>
    %82 = arith.addf %59, %81 : vector<8x32xf32>
    %83 = vector.extract_strided_slice %7 {offsets = [0, 24], sizes = [8, 8], strides = [1, 1]} : vector<8x32xf32> to vector<8x8xf32>
    %84 = vector.extract_strided_slice %9 {offsets = [0, 24], sizes = [8, 8], strides = [1, 1]} : vector<8x32xf32> to vector<8x8xf32>
    %85 = vector.extract_strided_slice %11 {offsets = [0, 24], sizes = [8, 8], strides = [1, 1]} : vector<8x32xf32> to vector<8x8xf32>
    %86 = tpu.transpose %84, [1, 0] : vector<8x8xf32> -> vector<8x8xf32>
    %cst_47 = arith.constant dense<0.000000e+00> : vector<8x8xf32>
    %87 = tpu.matmul %83, %86, %cst_47 {dimension_numbers = #tpu.dot_dimension_numbers<[1], [0], [0], [1], [0, 0, 1, 1], [], []>} : vector<8x8xf32>, vector<8x8xf32>, vector<8x8xf32> -> vector<8x8xf32>
    %cst_48 = arith.constant 0.353553385 : f32
    %88 = vector.broadcast %cst_48 : f32 to vector<8x8xf32>
    %89 = arith.mulf %87, %88 : vector<8x8xf32>
    %cst_49 = arith.constant dense<0xFF800000> : vector<8xf32>
    %90 = vector.multi_reduction <maximumf>, %89, %cst_49 [1] : vector<8x8xf32> to vector<8xf32>
    %91 = vector.shape_cast %90 : vector<8xf32> to vector<8x1xf32>
    %92 = vector.broadcast %91 : vector<8x1xf32> to vector<8x8xf32>
    %93 = arith.subf %89, %92 : vector<8x8xf32>
    %94 = math.exp %93 : vector<8x8xf32>
    %cst_50 = arith.constant dense<0.000000e+00> : vector<8xf32>
    %95 = vector.multi_reduction <add>, %94, %cst_50 [1] : vector<8x8xf32> to vector<8xf32>
    %96 = vector.shape_cast %95 : vector<8xf32> to vector<8x1xf32>
    %97 = vector.broadcast %96 : vector<8x1xf32> to vector<8x8xf32>
    %98 = arith.divf %94, %97 : vector<8x8xf32>
    %c0_51 = arith.constant 0 : index
    %c3 = arith.constant 3 : index
    %c0_52 = arith.constant 0 : index
    %c0_53 = arith.constant 0 : index
    %99 = vector.load %arg11[%c0_51, %c3, %c0_52, %c0_53] : memref<1x4x8x8xf32, #tpu.memory_space<vmem>>, vector<1x1x8x8xf32>
    %100 = vector.shape_cast %99 : vector<1x1x8x8xf32> to vector<8x8xf32>
    %101 = vector.shape_cast %98 : vector<8x8xf32> to vector<1x1x8x8xf32>
    tpu.vector_store %arg11[%c0_51, %c3, %c0_52, %c0_53], %101 {strides = array<i32>} : memref<1x4x8x8xf32, #tpu.memory_space<vmem>>, vector<1x1x8x8xf32>,
    %cst_54 = arith.constant dense<0.000000e+00> : vector<8x8xf32>
    %102 = tpu.matmul %98, %85, %cst_54 {dimension_numbers = #tpu.dot_dimension_numbers<[1], [0], [0], [1], [0, 0, 1, 1], [], []>} : vector<8x8xf32>, vector<8x8xf32>, vector<8x8xf32> -> vector<8x8xf32>
    %103 = vector.extract_strided_slice %12 {offsets = [24, 0], sizes = [8, 32], strides = [1, 1]} : vector<32x32xf32> to vector<8x32xf32>
    %cst_55 = arith.constant dense<0.000000e+00> : vector<8x32xf32>
    %104 = tpu.matmul %102, %103, %cst_55 {dimension_numbers = #tpu.dot_dimension_numbers<[1], [0], [0], [1], [0, 0, 1, 1], [], []>} : vector<8x8xf32>, vector<8x32xf32>, vector<8x32xf32> -> vector<8x32xf32>
    %105 = arith.addf %82, %104 : vector<8x32xf32>
    %106 = arith.addf %105, %1 : vector<8x32xf32>
    %cst_56 = arith.constant dense<0.000000e+00> : vector<8xf32>
    %107 = vector.multi_reduction <add>, %106, %cst_56 [1] : vector<8x32xf32> to vector<8xf32>
    %108 = vector.shape_cast %107 : vector<8xf32> to vector<8x1xf32>
    %cst_57 = arith.constant 3.200000e+01 : f32
    %109 = vector.broadcast %cst_57 : f32 to vector<8x1xf32>
    %110 = arith.divf %108, %109 : vector<8x1xf32>
    %111 = vector.broadcast %110 : vector<8x1xf32> to vector<8x32xf32>
    %112 = arith.subf %106, %111 : vector<8x32xf32>
    %113 = arith.mulf %112, %112 : vector<8x32xf32>
    %cst_58 = arith.constant dense<0.000000e+00> : vector<8xf32>
    %114 = vector.multi_reduction <add>, %113, %cst_58 [1] : vector<8x32xf32> to vector<8xf32>
    %115 = vector.shape_cast %114 : vector<8xf32> to vector<8x1xf32>
    %cst_59 = arith.constant 3.200000e+01 : f32
    %116 = vector.broadcast %cst_59 : f32 to vector<8x1xf32>
    %117 = arith.divf %115, %116 : vector<8x1xf32>
    %cst_60 = arith.constant 9.99999974E-6 : f32
    %118 = vector.broadcast %cst_60 : f32 to vector<8x1xf32>
    %119 = arith.addf %117, %118 : vector<8x1xf32>
    %120 = math.rsqrt %119 : vector<8x1xf32>
    %c0_61 = arith.constant 0 : index
    %c0_62 = arith.constant 0 : index
    %121 = vector.load %arg8[%c0_61, %c0_62] : memref<1x32xf32, #tpu.memory_space<vmem>>, vector<1x32xf32>
    %122 = vector.broadcast %121 : vector<1x32xf32> to vector<8x32xf32>
    %123 = vector.broadcast %120 : vector<8x1xf32> to vector<8x32xf32>
    %124 = arith.mulf %122, %123 : vector<8x32xf32>
    %c0_63 = arith.constant 0 : index
    %c0_64 = arith.constant 0 : index
    %125 = vector.load %arg9[%c0_63, %c0_64] : memref<1x32xf32, #tpu.memory_space<vmem>>, vector<1x32xf32>
    %126 = vector.broadcast %110 : vector<8x1xf32> to vector<8x32xf32>
    %127 = arith.mulf %126, %124 : vector<8x32xf32>
    %128 = vector.broadcast %125 : vector<1x32xf32> to vector<8x32xf32>
    %129 = arith.subf %128, %127 : vector<8x32xf32>
    %130 = arith.mulf %106, %124 : vector<8x32xf32>
    %131 = arith.addf %130, %129 : vector<8x32xf32>
    %c0_65 = arith.constant 0 : index
    %c0_66 = arith.constant 0 : index
    %c0_67 = arith.constant 0 : index
    %132 = vector.load %arg10[%c0_65, %c0_66, %c0_67] : memref<1x8x32xf32, #tpu.memory_space<vmem>>, vector<1x8x32xf32>
    %133 = vector.shape_cast %132 : vector<1x8x32xf32> to vector<8x32xf32>
    %134 = vector.shape_cast %131 : vector<8x32xf32> to vector<1x8x32xf32>
    tpu.vector_store %arg10[%c0_65, %c0_66, %c0_67], %134 {strides = array<i32>} : memref<1x8x32xf32, #tpu.memory_space<vmem>>, vector<1x8x32xf32>,
    return
  }
  func.func @transform_0(%arg0: i32) -> (i32, i32, i32) {
    %c0_i32 = arith.constant 0 : i32
    %c0_i32_0 = arith.constant 0 : i32
    %c0_i32_1 = arith.constant 0 : i32
    return %arg0, %c0_i32, %c0_i32_0 : i32, i32, i32
  }
  func.func @transform_1(%arg0: i32) -> (i32, i32, i32) {
    %c0_i32 = arith.constant 0 : i32
    %c0_i32_0 = arith.constant 0 : i32
    %c0_i32_1 = arith.constant 0 : i32
    return %arg0, %c0_i32, %c0_i32_0 : i32, i32, i32
  }
  func.func @transform_2(%arg0: i32) -> (i32, i32, i32) {
    %c0_i32 = arith.constant 0 : i32
    %c0_i32_0 = arith.constant 0 : i32
    %c0_i32_1 = arith.constant 0 : i32
    return %arg0, %c0_i32, %c0_i32_0 : i32, i32, i32
  }
  func.func @transform_3(%arg0: i32) -> (i32, i32) {
    %c0_i32 = arith.constant 0 : i32
    %c0_i32_0 = arith.constant 0 : i32
    %c0_i32_1 = arith.constant 0 : i32
    return %c0_i32, %c0_i32_0 : i32, i32
  }
  func.func @transform_4(%arg0: i32) -> (i32, i32) {
    %c0_i32 = arith.constant 0 : i32
    %c0_i32_0 = arith.constant 0 : i32
    %c0_i32_1 = arith.constant 0 : i32
    return %c0_i32, %c0_i32_0 : i32, i32
  }
  func.func @transform_5(%arg0: i32) -> (i32, i32) {
    %c0_i32 = arith.constant 0 : i32
    %c0_i32_0 = arith.constant 0 : i32
    %c0_i32_1 = arith.constant 0 : i32
    return %c0_i32, %c0_i32_0 : i32, i32
  }
  func.func @transform_6(%arg0: i32) -> (i32, i32) {
    %c0_i32 = arith.constant 0 : i32
    %c0_i32_0 = arith.constant 0 : i32
    %c0_i32_1 = arith.constant 0 : i32
    return %c0_i32, %c0_i32_0 : i32, i32
  }
  func.func @transform_7(%arg0: i32) -> (i32, i32) {
    %c0_i32 = arith.constant 0 : i32
    %c0_i32_0 = arith.constant 0 : i32
    %c0_i32_1 = arith.constant 0 : i32
    return %c0_i32, %c0_i32_0 : i32, i32
  }
  func.func @transform_8(%arg0: i32) -> (i32, i32) {
    %c0_i32 = arith.constant 0 : i32
    %c0_i32_0 = arith.constant 0 : i32
    %c0_i32_1 = arith.constant 0 : i32
    return %c0_i32, %c0_i32_0 : i32, i32
  }
  func.func @transform_9(%arg0: i32) -> (i32, i32, i32) {
    %c0_i32 = arith.constant 0 : i32
    %c0_i32_0 = arith.constant 0 : i32
    %c0_i32_1 = arith.constant 0 : i32
    return %arg0, %c0_i32, %c0_i32_0 : i32, i32, i32
  }
  func.func @transform_10(%arg0: i32) -> (i32, i32, i32, i32) {
    %c0_i32 = arith.constant 0 : i32
    %c0_i32_0 = arith.constant 0 : i32
    %c0_i32_1 = arith.constant 0 : i32
    %c0_i32_2 = arith.constant 0 : i32
    return %arg0, %c0_i32, %c0_i32_0, %c0_i32_1 : i32, i32, i32, i32
  }
}

</mosaic_0001>

<bundles_post_ra>
// kernel: tpu_custom_call.1
= control target key start
LH: loop header
LB: loop body
LE: loop exit
PB: predicated region body
PF: predicated region fallthrough
CT: control target
= control target key end

     0   :  { %s3199_s0 = inlined_call_operand.hbm [shape: f32[2,8,32], index: 0, kind: input, shape index: {}]   ;;  %s3200_s1 = inlined_call_operand.hbm [shape: f32[2,8,32], index: 1, kind: input, shape index: {}]   ;;  %s3201_s2 = inlined_call_operand.hbm [shape: f32[2,8,32], index: 2, kind: input, shape index: {}]   ;;  %s3202_s3 = inlined_call_operand.hbm [shape: f32[32,32], index: 3, kind: input, shape index: {}]   ;;  %s3203_s4 = inlined_call_operand.hbm [shape: f32[32,32], index: 4, kind: input, shape index: {}]   ;;  %s3204_s5 = inlined_call_operand.hbm [shape: f32[32,32], index: 5, kind: input, shape index: {}]   ;;  %s3205_s6 = inlined_call_operand.hbm [shape: f32[32,32], index: 6, kind: input, shape index: {}]   ;;  %s3206_s7 = inlined_call_operand.vmem [shape: f32[1,32], index: 7, kind: input, shape index: {}]   ;;  %s3207_s8 = inlined_call_operand.vmem [shape: f32[1,32], index: 8, kind: input, shape index: {}]   ;;  %s3208_s9 = inlined_call_operand.hbm [shape: f32[2,8,32], index: 9, kind: output, shape index: {0}]   ;;  %s3209_s10 = inlined_call_operand.hbm [shape: f32[2,4,8,8], index: 10, kind: output, shape index: {1}]  }
   0x1   :  { %3234 = sst [smem:[#allocation28_spill]] %s3200_s1 }
   0x2   :  { %3235 = sst [smem:[#allocation29_spill]] %s3202_s3 }
   0x3   :  { %3236 = sst [smem:[#allocation30_spill]] %s3204_s5 }
   0x4   :  { %3237 = sst [smem:[#allocation31_spill]] %s3206_s7 }
   0x5   :  { %3238 = sst [smem:[#allocation32_spill]] %s3207_s8 }
   0x6   :  { %3239 = sst [smem:[#allocation33_spill]] %s3208_s9 }
   0x7   :  { %3240 = sst [smem:[#allocation34_spill]] %s3209_s10 }
   0x8   :  { %16 = vsyncpa [#allocation3], 0 }
   0x9   :  { %18 = vsyncpa [#allocation3 + $0x1], 0 }
   0xa   :  { %19 = vsyncpa [#allocation6], 0 }
   0xb   :  { %21 = vsyncpa [#allocation6 + $0x1], 0 }
   0xc   :  { %22 = vsyncpa [#allocation9], 0 }
   0xd   :  { %23 = vsyncpa [#allocation12], 0 }
   0xe   :  { %24 = vsyncpa [#allocation4], 0 }
   0xf   :  { %26 = vsyncpa [#allocation4 + $0x1], 0 }
  0x10   :  { %27 = vsyncpa [#allocation16], 0 }
  0x11   :  { %29 = vsyncpa [#allocation16 + $0x1], 0  ;;  %s2691_s13 = smov 0   ;;  %s2693_s14 = smov 0  }
  0x12   :  { %s2695_s15 = smov 0   ;;  %s2697_s16 = smov 0  }
  0x13 LB: > { %3241 = sst [smem:[#allocation23_spill]] %s2603_s13  ;;  %s2617_s17 = smov [#allocation8]   ;;  %s2615_s16 = sphi %s2697_s16, %s3282_s16   ;;  %s2611_s15 = sphi %s2695_s15, %s3286_s15   ;;  %s2607_s14 = sphi %s2693_s14, %s3285_s14   ;;  %s2603_s13 = sphi %s2691_s13, %s3284_s13  }
  0x14   : > { %3242 = sst [smem:[#allocation24_spill]] %s2615_s16  ;;  %s308_s18 = sshll.u32 %s2617_s17, 4  ;;  %s2717_s18 = int_to_ptr.vmem [resolvable:$true] %s308_s18 }
  0x15   : > { %s2712_s19 = sadd.s32 4294967295, %s2615_s16   ;;  %p1969_p0 = scmp.ge.s32.totalorder %s2615_s16, 1 }
  0x16   : > { %p3222_p1 = scmp.eq.s32.totalorder %s2712_s19, 0  ;;  %p296_p2 = scmp.lt.s32.totalorder %s2615_s16, 3 }
  0x17   : > { %s2618_s21 = smov [#allocation11]   ;;  %s3245_s3 = sld [smem:[#allocation29_spill]] }
  0x18   : > { %p2719_p3 = pnand %p1969_p0, %p296_p2  ;;  %s334_s22 = sshll.u32 %s2618_s21, 4  ;;  %s2732_s22 = int_to_ptr.vmem [resolvable:$true] %s334_s22 }
  0x1a   : > { %s3243_s20 = scalar_select %p2719_p3, 1, 0 }
  0x1b   : > { %p2199_p5 = pneg %p2719_p3 }
  0x1d   : > { %p2728_p6 = pnand %p2199_p5, %p3222_p1  ;;  %s2303_s26 = scalar_lea.hbm %s3245_s3, 512 }
  0x1e   : > { %p2304_p7 = scmp.ne.s32.totalorder %s3245_s3, %s2303_s26  ;;  %p2310_p11 = scmp.lt.u32.totalorder %s2303_s26, %s3245_s3 }
  0x1f   : > { %s3244_s23 = scalar_select %p2728_p6, 1, 0 }
  0x20   : > { %p2742_p8 = pneg %p2728_p6 }
  0x22   : > { %s3246_s29 = scalar_select %p2742_p8, 1, 0 }
  0x23   : > { %p2306_p9 = pnand %p2742_p8, %p2304_p7 }
  0x25   : > { %p2307_p10 = pneg %p2306_p9 }
  0x27   : > { %p2312_p12 = pnand %p2310_p11, %p2307_p10 }
  0x29   : > { %2315 = shalt.err (!%p2312_p12)
}
  0x2a   : > { %s2316_s12 = scalar_lea.vmem %s2717_s18, 512  ;;  %p2324_p5 = scmp.lt.s32.totalorder %s2717_s18, %s2717_s18 }
  0x2b   : > { %p2317_p13 = scmp.ne.s32.totalorder %s2717_s18, %s2316_s12  ;;  %p2325_p4 = scmp.lt.s32.totalorder %s2316_s12, %s2316_s12 }
  0x2d   : > { %p2319_p0 = pnand %p2317_p13, %p2742_p8  ;;  %p2326_p7 = por %p2325_p4, %p2324_p5 }
  0x2f   : > { %p2320_p2 = pneg %p2319_p0 }
  0x31   : > { %p2327_p9 = pnand %p2326_p7, %p2320_p2 }
  0x33   : > { %2330 = shalt.err (!%p2327_p9)
}
  0x34   : > { %s3212_s17 = smov 128   ;;  %s3214_s21 = smov 8  }
  0x35   : > { %2202 = dma.hbm_to_vmem [thread:$0]  (!%p2728_p6), %s3245_s3, 512, %s2717_s18, [#allocation9], %s3212_s17, %s3212_s17, %s3214_s21  }
  0x36   : > { %s3247_s5 = sld [smem:[#allocation30_spill]] }
  0x3c   : > { %s2331_s28 = scalar_lea.hbm %s3247_s5, 512 }
  0x3d   : > { %p2332_p4 = scmp.ne.s32.totalorder %s3247_s5, %s2331_s28  ;;  %p2338_p12 = scmp.lt.u32.totalorder %s2331_s28, %s3247_s5 }
  0x3f   : > { %p2334_p10 = pnand %p2332_p4, %p2742_p8 }
  0x41   : > { %p2335_p11 = pneg %p2334_p10 }
  0x43   : > { %p2340_p13 = pnand %p2338_p12, %p2335_p11 }
  0x45   : > { %2343 = shalt.err (!%p2340_p13)
}
  0x46   : > { %s2344_s18 = scalar_lea.vmem %s2732_s22, 512  ;;  %p2352_p7 = scmp.lt.s32.totalorder %s2732_s22, %s2732_s22 }
  0x47   : > { %p2345_p0 = scmp.ne.s32.totalorder %s2732_s22, %s2344_s18  ;;  %p2353_p9 = scmp.lt.s32.totalorder %s2344_s18, %s2344_s18 }
  0x49   : > { %p2347_p2 = pnand %p2345_p0, %p2742_p8  ;;  %p2354_p4 = por %p2353_p9, %p2352_p7 }
  0x4b   : > { %p2348_p5 = pneg %p2347_p2 }
  0x4d   : > { %p2355_p10 = pnand %p2354_p4, %p2348_p5 }
  0x4f   : > { %2358 = shalt.err (!%p2355_p10)
}
  0x50   : > { %2208 = dma.hbm_to_vmem [thread:$0]  (!%p2728_p6), %s3247_s5, 512, %s2732_s22, [#allocation12], %s3212_s17, %s3212_s17, %s3214_s21  }
  0x51   : > { %s1968_s25 = sadd.s32 4294967294, %s2615_s16   ;;  %s2794_s26 = sadd.s32 1, %s2615_s16  }
  0x52   : > { %3248 = sst [smem:[#allocation25_spill]] %s2794_s26  ;;  %s39_s27 = ssub.s32 %s2615_s16, %s2794_s26 }
  0x53   : > { %s42_s28 = sadd.s32 1, %s2611_s15  ;;  %p40_p11 = scmp.eq.s32.totalorder %s39_s27, 0 }
  0x54   : > { %p49_p12 = scmp.ne.s32.totalorder %s2611_s15, %s2607_s14  ;;  %p50_p13 = scmp.eq.s32.totalorder %s2615_s16, 0 }
  0x55   : > { %p55_p0 = scmp.ne.s32.totalorder %s2607_s14, %s2603_s13  ;;  %p257_p7 = scmp.eq.s32.totalorder %s2712_s19, 1 }
  0x56   : > { %s2805_s30 = scalar_select %p40_p11, %s2611_s15, %s42_s28  }
  0x57   : > { %p51_p2 = por %p50_p13, %p49_p12  ;;  %p2809_p5 = por %p3222_p1, %p55_p0 }
  0x58   : > { %3249 = sst [smem:[#allocation26_spill]] %s2805_s30  ;;  %p263_p9 = scmp.eq.s32.totalorder %s1968_s25, 1 }
  0x59   : > { %s3250_s11 = scalar_select %p2809_p5, 1, 0 }
  0x5a   : > { %p2233_p4 = scmp.lt.s32.totalorder %s2615_s16, 2  ;;  %s3216_s22 = sand.u32 1, %s2611_s15  }
  0x5b   : > { %p2816_p10 = por %p257_p7, %p49_p12  ;;  %p2820_p3 = por %p263_p9, %p55_p0 }
  0x5c   : > { %s2826_s9 = sshll.u32 %s3216_s22, 3  ;;  %s2829_s24 = sshll.u32 %s2615_s16, 7 }
  0x5d   : > { %s3251_s12 = scalar_select %p2816_p10, 1, 0 }
  0x5e   : > { %s3252_s18 = scalar_select %p2820_p3, 1, 0 }
  0x5f   : > { %p2831_p11 = pnand %p2233_p4, %p51_p2  ;;  %s385_s25 = sand.u32 1, %s2615_s16  }
  0x60   : > { %3253 = sst [smem:[#allocation27_spill]] %s3252_s18  ;;  %s3255_s1 = sld [smem:[#allocation28_spill]] }
  0x61   : > { %s3254_s27 = scalar_select %p2831_p11, 1, 0 }
  0x62   : > { %s389_s22 = scalar_lea.vmem [#allocation5], %s2826_s9  ;;  %s2621_s5 = smov [#allocation10]  }
  0x63   : > { %s396_s3 = sshll.u32 %s389_s22, 4  ;;  %s2845_s30 = sshll.u32 %s2621_s5, 4  ;;  %s2843_s3 = int_to_ptr.vmem [resolvable:$true] %s396_s3  ;;  %s322_s30 = int_to_ptr.vmem [resolvable:$true] %s2845_s30 }
  0x64   : > { %s2847_s26 = scalar_lea.sflag [#allocation6], %s385_s25  ;;  %p2853_p13 = pneg %p2831_p11 }
  0x66   : > { %s2840_s21 = scalar_lea.hbm %s3255_s1, %s2829_s24  ;;  %s2364_s16 = scalar_lea.hbm %s3255_s1, 256 }
  0x67   : > { %s2359_s18 = scalar_lea.hbm %s2840_s21, 128  ;;  %p2365_p7 = scmp.lt.u32.totalorder %s2840_s21, %s3255_s1 }
  0x68   : > { %p2360_p12 = scmp.ne.s32.totalorder %s2840_s21, %s2359_s18  ;;  %p2366_p9 = scmp.lt.u32.totalorder %s2364_s16, %s2359_s18 }
  0x69   : > { %s3256_s17 = scalar_select %p2853_p13, 1, 0 }
  0x6a   : > { %p2362_p0 = pnand %p2853_p13, %p2360_p12  ;;  %p2367_p4 = por %p2366_p9, %p2365_p7 }
  0x6b   : > { %p2368_p1 = scmp.lt.u32.totalorder %s2359_s18, %s2840_s21 }
  0x6c   : > { %p2363_p2 = pneg %p2362_p0 }
  0x6d   : > { %p2369_p3 = por %p2368_p1, %p2367_p4 }
  0x6f   : > { %p2370_p10 = pnand %p2369_p3, %p2363_p2 }
  0x71   : > { %2373 = shalt.err (!%p2370_p10)
}
  0x72   : > { %s2374_s25 = scalar_lea.vmem %s2843_s3, 128  ;;  %s2622_s28 = smov [#allocation5]  }
  0x73   : > { %p2375_p12 = scmp.ne.s32.totalorder %s2843_s3, %s2374_s25  ;;  %s2379_s22 = sshll.u32 %s2622_s28, 4  ;;  %s2380_s22 = int_to_ptr.vmem [resolvable:$false] %s2379_s22 }
  0x74   : > { %s2381_s13 = scalar_lea.vmem %s2380_s22, 256  ;;  %p2382_p6 = scmp.lt.s32.totalorder %s2843_s3, %s2380_s22 }
  0x75   : > { %p2377_p0 = pnand %p2375_p12, %p2853_p13  ;;  %p2383_p8 = scmp.lt.s32.totalorder %s2381_s13, %s2374_s25 }
  0x77   : > { %p2378_p5 = pneg %p2377_p0  ;;  %p2384_p7 = por %p2383_p8, %p2382_p6 }
  0x79   : > { %p2385_p9 = pnand %p2384_p7, %p2378_p5 }
  0x7b   : > { %2388 = shalt.err (!%p2385_p9)
}
  0x7c   : > { %2218 = dma.hbm_to_vmem [thread:$0]  (!%p2831_p11), %s2840_s21, 128, %s2843_s3, %s2847_s26  }
  0x7d   : > { %s2389_s5 = scalar_lea.hbm %s3203_s4, 512  ;;  %p3257_p3 = scmp.ne.s32.totalorder %s3246_s29, 0 }
  0x7e   : > { %p2390_p1 = scmp.ne.s32.totalorder %s3203_s4, %s2389_s5  ;;  %p2396_p5 = scmp.lt.u32.totalorder %s2389_s5, %s3203_s4 }
  0x80   : > { %p2392_p6 = pnand %p2390_p1, %p3257_p3 }
  0x82   : > { %p2393_p8 = pneg %p2392_p6 }
  0x84   : > { %p2398_p10 = pnand %p2396_p5, %p2393_p8 }
  0x86   : > { %2401 = shalt.err (!%p2398_p10)
}
  0x87   : > { %s2402_s13 = scalar_lea.vmem %s322_s30, 512  ;;  %p2410_p0 = scmp.lt.s32.totalorder %s322_s30, %s322_s30 }
  0x88   : > { %p2403_p2 = scmp.ne.s32.totalorder %s322_s30, %s2402_s13  ;;  %p2411_p7 = scmp.lt.s32.totalorder %s2402_s13, %s2402_s13 }
  0x8a   : > { %p2405_p4 = pnand %p2403_p2, %p3257_p3  ;;  %p2412_p9 = por %p2411_p7, %p2410_p0 }
  0x8c   : > { %p2406_p12 = pneg %p2405_p4 }
  0x8e   : > { %p2413_p11 = pnand %p2412_p9, %p2406_p12 }
  0x90   : > { %2416 = shalt.err (!%p2413_p11)
}
  0x91   : > { %p3258_p1 = scmp.ne.s32.totalorder %s3244_s23, 0  ;;  %s3259_s1 = smov 8  }
  0x92   : > { %s3260_s3 = smov 128   ;;  %s2623_s18 = smov [#allocation13]  }
  0x93   : > { %2205 = dma.hbm_to_vmem [thread:$0]  (!%p3258_p1), %s3203_s4, 512, %s322_s30, [#allocation9], %s3260_s3, %s3260_s3, %s3259_s1  }
  0x94   : > { %s347_s5 = sshll.u32 %s2623_s18, 4  ;;  %s2417_s22 = scalar_lea.hbm %s3205_s6, 512  ;;  %s348_s5 = int_to_ptr.vmem [resolvable:$true] %s347_s5 }
  0x95   : > { %p2418_p11 = scmp.ne.s32.totalorder %s3205_s6, %s2417_s22  ;;  %p2424_p5 = scmp.lt.u32.totalorder %s2417_s22, %s3205_s6 }
  0x97   : > { %p2420_p6 = pnand %p2418_p11, %p3257_p3 }
  0x99   : > { %p2421_p8 = pneg %p2420_p6 }
  0x9b   : > { %p2426_p10 = pnand %p2424_p5, %p2421_p8 }
  0x9d   : > { %2429 = shalt.err (!%p2426_p10)
}
  0x9e   : > { %s2430_s30 = scalar_lea.vmem %s348_s5, 512  ;;  %p2438_p0 = scmp.lt.s32.totalorder %s348_s5, %s348_s5 }
  0x9f   : > { %p2431_p2 = scmp.ne.s32.totalorder %s348_s5, %s2430_s30  ;;  %p2439_p7 = scmp.lt.s32.totalorder %s2430_s30, %s2430_s30 }
  0xa1   : > { %p2433_p4 = pnand %p2431_p2, %p3257_p3  ;;  %p2440_p9 = por %p2439_p7, %p2438_p0 }
  0xa3   : > { %p2434_p12 = pneg %p2433_p4 }
  0xa5   : > { %p2441_p13 = pnand %p2440_p9, %p2434_p12 }
  0xa7   : > { %2444 = shalt.err (!%p2441_p13)
}
  0xa8   : > { %2211 = dma.hbm_to_vmem [thread:$0]  (!%p3258_p1), %s3205_s6, 512, %s348_s5, [#allocation12], %s3260_s3, %s3260_s3, %s3259_s1  }
  0xa9   : > { %s2924_s21 = scalar_lea.hbm %s3199_s0, %s2829_s24  ;;  %s371_s23 = scalar_lea.vmem [#allocation2], %s2826_s9 }
  0xaa   : > { %s378_s16 = sshll.u32 %s371_s23, 4  ;;  %s3261_s18 = sand.u32 1, %s2611_s15   ;;  %s379_s16 = int_to_ptr.vmem [resolvable:$true] %s378_s16 }
  0xab   : > { %s368_s28 = scalar_lea.sflag [#allocation3], %s3261_s18  ;;  %s2445_s25 = scalar_lea.hbm %s2924_s21, 128 }
  0xac   : > { %p2446_p13 = scmp.ne.s32.totalorder %s2924_s21, %s2445_s25  ;;  %p3262_p3 = scmp.ne.s32.totalorder %s3256_s17, 0 }
  0xad   : > { %s2450_s5 = scalar_lea.hbm %s3199_s0, 256  ;;  %p2451_p1 = scmp.lt.u32.totalorder %s2924_s21, %s3199_s0 }
  0xae   : > { %p2448_p11 = pnand %p2446_p13, %p3262_p3  ;;  %p2452_p8 = scmp.lt.u32.totalorder %s2450_s5, %s2445_s25 }
  0xaf   : > { %p2454_p10 = scmp.lt.u32.totalorder %s2445_s25, %s2924_s21 }
  0xb0   : > { %p2449_p6 = pneg %p2448_p11  ;;  %p2453_p5 = por %p2452_p8, %p2451_p1 }
  0xb2   : > { %p2455_p2 = por %p2454_p10, %p2453_p5 }
  0xb4   : > { %p2456_p4 = pnand %p2455_p2, %p2449_p6 }
  0xb6   : > { %2459 = shalt.err (!%p2456_p4)
}
  0xb7   : > { %s2460_s30 = scalar_lea.vmem %s379_s16, 128  ;;  %s2624_s7 = smov [#allocation2]  }
  0xb8   : > { %p2461_p12 = scmp.ne.s32.totalorder %s379_s16, %s2460_s30  ;;  %s2465_s8 = sshll.u32 %s2624_s7, 4  ;;  %s2466_s8 = int_to_ptr.vmem [resolvable:$false] %s2465_s8 }
  0xb9   : > { %s2467_s10 = scalar_lea.vmem %s2466_s8, 256  ;;  %p2468_p9 = scmp.lt.s32.totalorder %s379_s16, %s2466_s8 }
  0xba   : > { %p2463_p0 = pnand %p2461_p12, %p3262_p3  ;;  %p2469_p13 = scmp.lt.s32.totalorder %s2467_s10, %s2460_s30 }
  0xbc   : > { %p2464_p7 = pneg %p2463_p0  ;;  %p2470_p11 = por %p2469_p13, %p2468_p9 }
  0xbe   : > { %p2471_p1 = pnand %p2470_p11, %p2464_p7 }
  0xc0   : > { %2474 = shalt.err (!%p2471_p1)
}
  0xc1   : > { %p3263_p8 = scmp.ne.s32.totalorder %s3254_s27, 0  ;;  %s2950_s18 = scalar_lea.hbm %s3201_s2, %s2829_s24 }
  0xc2   : > { %s407_s25 = scalar_lea.vmem [#allocation7], %s2826_s9  ;;  %s2475_s3 = scalar_lea.hbm %s2950_s18, 128 }
  0xc3   : > { %2215 = dma.hbm_to_vmem [thread:$0]  (!%p3263_p8), %s2924_s21, 128, %s379_s16, %s368_s28  }
  0xc4   : > { %s414_s1 = sshll.u32 %s407_s25, 4  ;;  %p2476_p6 = scmp.ne.s32.totalorder %s2950_s18, %s2475_s3  ;;  %s415_s1 = int_to_ptr.vmem [resolvable:$true] %s414_s1 }
  0xc5   : > { %s2480_s21 = scalar_lea.hbm %s3201_s2, 256  ;;  %p2481_p2 = scmp.lt.u32.totalorder %s2950_s18, %s3201_s2 }
  0xc6   : > { %p2478_p5 = pnand %p2476_p6, %p3262_p3  ;;  %p2482_p4 = scmp.lt.u32.totalorder %s2480_s21, %s2475_s3 }
  0xc7   : > { %p2484_p0 = scmp.lt.u32.totalorder %s2475_s3, %s2950_s18 }
  0xc8   : > { %p2479_p10 = pneg %p2478_p5  ;;  %p2483_p12 = por %p2482_p4, %p2481_p2 }
  0xca   : > { %p2485_p7 = por %p2484_p0, %p2483_p12 }
  0xcc   : > { %p2486_p9 = pnand %p2485_p7, %p2479_p10 }
  0xce   : > { %2489 = shalt.err (!%p2486_p9)
}
  0xcf   : > { %s2490_s9 = scalar_lea.vmem %s415_s1, 128  ;;  %s2625_s24 = smov [#allocation7]  }
  0xd0   : > { %p2491_p13 = scmp.ne.s32.totalorder %s415_s1, %s2490_s9  ;;  %s2495_s13 = sshll.u32 %s2625_s24, 4  ;;  %s2496_s13 = int_to_ptr.vmem [resolvable:$false] %s2495_s13 }
  0xd1   : > { %s2497_s30 = scalar_lea.vmem %s2496_s13, 256  ;;  %p2498_p6 = scmp.lt.s32.totalorder %s415_s1, %s2496_s13 }
  0xd2   : > { %p2493_p11 = pnand %p2491_p13, %p3262_p3  ;;  %p2499_p5 = scmp.lt.s32.totalorder %s2497_s30, %s2490_s9 }
  0xd4   : > { %p2494_p1 = pneg %p2493_p11  ;;  %p2500_p8 = por %p2499_p5, %p2498_p6 }
  0xd6   : > { %p2501_p2 = pnand %p2500_p8, %p2494_p1 }
  0xd8   : > { %2504 = shalt.err (!%p2501_p2)
}
  0xd9   : > { %p3264_p4 = scmp.ne.s32.totalorder %s3254_s27, 0  ;;  %p3265_p10 = scmp.ne.s32.totalorder %s3243_s20, 0 }
  0xda   : > { %s2974_s17 = sand.u32 (!%p3265_p10), 1, %s2607_s14   ;;  %p3266_p3 = scmp.ne.s32.totalorder (!%p3265_p10), %s3250_s11, 0 }
  0xdb   : > { %2221 = dma.hbm_to_vmem [thread:$0]  (!%p3264_p4), %s2950_s18, 128, %s415_s1, %s2847_s26  }
  0xdc   : > { %423 = sbr.rel (%p3265_p10) target bundleno = 3139 (0xc43), region = 56  ;;  %s2977_s7 = sshll.u32 (!%p3265_p10), %s2974_s17, 3 }
  0xdd   : > { %s426_s8 = scalar_lea.sflag (!%p3265_p10), [#allocation3], %s2974_s17  ;;  %s429_s10 = scalar_lea.vmem (!%p3265_p10), [#allocation2], %s2977_s7 }
  0xe3   : > { %2578 = dma.done.wait (%p3266_p3), %s426_s8, 128  }
  0xe4   : > { %2580 = vsyncadd (%p3266_p3), %s426_s8, 4294967168  ;;  %s434_s20 = sand.u32 1, %s2712_s19   ;;  %s438_s27 = scalar_lea.vmem [#allocation5], %s2977_s7 }
  0xe5   : > { %s435_s26 = scalar_lea.sflag [#allocation6], %s434_s20 }
  0xe6   : > { %2582 = dma.done.wait (%p3266_p3), %s435_s26, 256  }
  0xe7   : > { %2584 = vsyncadd (%p3266_p3), %s435_s26, 4294967040  ;;  %s447_s29 = scalar_lea.vmem [#allocation7], %s2977_s7  ;;  %p3267_p8 = scmp.eq.s32.totalorder %s2712_s19, 0 }
  0xe9   : > { %2586 = dma.done.wait (%p3267_p8), [#allocation9], 1024   ;;  %p3268_p12 = pmov %p3267_p8 }
  0xea   : > { %p3269_p0 = pmov %p3267_p8 }
  0xeb   : > { %2588 = vsyncadd (%p3268_p12), [#allocation9], 4294966272 }
  0xec   : > { %2590 = dma.done.wait (%p3269_p0), [#allocation12], 1024   ;;  %p3270_p7 = pmov %p3269_p0 }
  0xed   : > { %v2626_v0 = vmov 0.0|0.0   ;;  %vm2627_vm0 = vmmov 0   ;;  %v2628_v1 = vmov 0.0   ;;  %v596_v2 = vld [vmem:[#allocation10] sm:$0xff]  ;;  %v597_v3 = vld [vmem:[#allocation10 + $0x8] sm:$0xff]  ;;  %v598_v7 = vld [vmem:[#allocation10 + $0x10] sm:$0xff] }
  0xee   : > { %2592 = vsyncadd (%p3270_p7), [#allocation12], 4294966272  ;;  %2161 = vmatprep.subr.bf16.mxu1 %v2626_v0  ;;  %2155 = vmatprep.subr.bf16.mxu0 %v2626_v0  ;;  %v518_v4 = vld [vmem:[#allocation8] sm:$0xff]  ;;  %v2162_v5 = vpack.c.bf16 %v597_v3, %v596_v2  ;;  %v519_v6 = vld [vmem:[#allocation8 + $0x8] sm:$0xff]  ;;  %vm522_vm1 = vcmask 261120   ;;  %vm754_vm2 = vcmask 64512  }
  0xef   : > { %2081 = vmatprep.mubr.msk.f32.mxu1 %vm2627_vm0, %v2628_v1  ;;  %2070 = vmatprep.mubr.msk.f32.mxu0 %vm2627_vm0, %v2628_v1  ;;  %v599_v8 = vld [vmem:[#allocation10 + $0x18] sm:$0xff]  ;;  %v2156_v9 = vpack.c.bf16 %v519_v6, %v518_v4  ;;  %v520_v10 = vld [vmem:[#allocation8 + $0x10] sm:$0xff]  ;;  %v516_v14 = vld [vmem:[%s438_s27] sm:$0xff]  ;;  %s2629_s11 = smov 120   ;;  %s2630_s23 = smov 112  }
  0xf0   : > { %v521_v11 = vld [vmem:[#allocation8 + $0x18] sm:$0xff]  ;;  %2163 = vmatpush3.bf16.msra.mxu1 %v2162_v5  ;;  %v2165_v12 = vpack.c.bf16 %v599_v8, %v598_v7  ;;  %v673_v16 = vld [vmem:[#allocation11] sm:$0xff]  ;;  %v674_v17 = vld [vmem:[#allocation11 + $0x8] sm:$0xff]  ;;  %s2631_s18 = smov 104   ;;  %s1990_s25 = sshll.u32 %s2974_s17, 5 }
  0xf1   : > { %2157 = vmatpush3.bf16.msra.mxu0 %v2156_v9  ;;  %2164 = vmatprep.subr.bf16.mxu1 %v2626_v0  ;;  %v2159_v13 = vpack.c.bf16 %v521_v11, %v520_v10  ;;  %v3008_v15 = vld [vmem:[%s429_s10] sm:$0xff]  ;;  %v2168_v19 = vpack.c.bf16 %v674_v17, %v673_v16  ;;  %s3054_s1 = scalar_lea.vmem [#allocation15], %s1990_s25  ;;  %v751_v52 = vld [vmem:[#allocation13 + $0x8] sm:$0xff]  ;;  %v750_v57 = vld [vmem:[#allocation13] sm:$0xff]  ;;  %s2022_s3 = sshll.u32 %s2712_s19, 9 }
  0xf2   : > { %2158 = vmatprep.subr.bf16.mxu0 %v2626_v0  ;;  %v675_v18 = vld [vmem:[#allocation11 + $0x10] sm:$0xff]  ;;  %v676_v20 = vld [vmem:[#allocation11 + $0x18] sm:$0xff]  ;;  %s1782_s5 = sshll.u32 %s3054_s1, 4  ;;  %s3271_s16 = sld [smem:[#allocation34_spill]]  ;;  %s3117_s5 = int_to_ptr.vmem [resolvable:$true] %s1782_s5 }
  0xf3   : > { %v2171_v21 = vpack.c.bf16 %v676_v20, %v675_v18  ;;  %v517_v22 = vld [vmem:[%s447_s29] sm:$0xff]  ;;  %s1756_s24 = scalar_lea.sflag [#allocation16], %s2974_s17  ;;  %s2505_s13 = scalar_lea.vmem %s3117_s5, 512 }
  0xf4   : > { %2166 = vmatpush3.bf16.msra.mxu1 %v2165_v12  ;;  %p2506_p9 = scmp.ne.s32.totalorder %s3117_s5, %s2505_s13  ;;  %p3273_p13 = scmp.ne.s32.totalorder %s3251_s12, 0 }
  0xf5   : > { %2160 = vmatpush3.bf16.msra.mxu0 %v2159_v13  ;;  %2095 = vmatprep.subr.mxu1 %v2628_v1  ;;  %s2632_s30 = smov [#allocation15]  }
  0xf6   : > { %2167 = vmatprep.subr.bf16.mxu0 %v2626_v0  ;;  %p2507_p11 = pnand %p2506_p9, %p3273_p13  ;;  %s2509_s8 = sshll.u32 %s2632_s30, 4  ;;  %s2510_s8 = int_to_ptr.vmem [resolvable:$false] %s2509_s8 }
  0xf7   : > { %2082 = vmatmul.mubr.msk.f32.vlgmr.msra.gmra.mrb[0].mxu1 %vm522_vm1, %v516_v14  ;;  %s2511_s10 = scalar_lea.vmem %s2510_s8, 1024  ;;  %p2512_p6 = scmp.lt.s32.totalorder %s3117_s5, %s2510_s8 }
  0xf8   : > { %2071 = vmatmul.mubr.msk.f32.vlgmr.msra.gmra.mrb[0].mxu0 %vm522_vm1, %v3008_v15  ;;  %2097 = vmatprep.mubr.msk.f32.mxu1 %vm2627_vm0, %v2628_v1  ;;  %s3272_s28 = smov %s3271_s16  ;;  %s3115_s9 = scalar_lea.hbm %s3271_s16, %s2022_s3 }
  0xf9   : > { %2092 = vmatprep.mubr.msk.f32.mxu0 %vm2627_vm0, %v2628_v1  ;;  %2169 = vmatpush3.bf16.msra.mxu0 %v2168_v19  ;;  %p2508_p1 = pneg %p2507_p11  ;;  %p2513_p5 = scmp.lt.s32.totalorder %s2511_s10, %s2505_s13 }
  0xfa   : > { %2170 = vmatprep.subr.bf16.mxu0 %v2626_v0 }
  0xfb   : > { %p2514_p2 = por %p2513_p5, %p2512_p6 }
  0xfd   : > { %2172 = vmatpush3.bf16.msra.mxu0 %v2171_v21  ;;  %p2515_p4 = pnand %p2514_p2, %p2508_p1 }
  0xfe   : > { %2105 = vmatprep.subr.mxu0 %v2628_v1 }
 0x100   : > { %2093 = vmatmul.mubr.msk.f32.vlgmr.msra.gmra.mrb[2].mxu0 %vm522_vm1, %v517_v22  ;;  %v752_v22 = vld [vmem:[#allocation13 + $0x10] sm:$0xff] }
 0x101   : > { %2107 = vmatprep.mubr.msk.f32.mxu0 %vm2627_vm0, %v2628_v1 }
 0x1ca   : > { %v669_v23 = vpop.f32.mrb[0].mxu1 }
 0x1cb   : > { %919 = vrot.lane.b32.xlu0 %v669_v23, %s2629_s11  ;;  %v2083_v24 = vpop.f32.mrb[1].mxu1  ;;  %2096 = vmatpush3.xpose.msk.msra.mxu1 %vm754_vm2, %v669_v23  ;;  %v3026_v25 = vpop.f32.mrb[0].mxu0 }
 0x1cc   : > { %v2072_v26 = vpop.f32.mrb[1].mxu0  ;;  %2100 = vmatprep.subr.mxu1 %v2628_v1 }
 0x1ce   : > { %2098 = vmatmul.mubr.msk.f32.vlgmr.msra.gmra.mrb[2].mxu1 %vm754_vm2, %v3026_v25 }
 0x1cf   : > { %917 = vrot.lane.b32.xlu0 %v3026_v25, %s2629_s11  ;;  %2102 = vmatprep.mubr.msk.f32.mxu1 %vm2627_vm0, %v2628_v1 }
 0x1d3   : > { %v3040_v29 = vpop.f32.mrb[2].mxu0 }
 0x1d4   : > { %v2094_v30 = vpop.f32.mrb[3].mxu0  ;;  %2101 = vmatpush3.msra.mxu1 %v3040_v29 }
 0x1d5   : > { %2110 = vmatprep.subr.mxu1 %v2628_v1 }
 0x23d   : > { %v920_v27 = vpop.permute.xlu0 %919 }
 0x23e   : > { %2106 = vmatpush3.xpose.msk.msra.mxu0 %vm754_vm2, %v920_v27 }
 0x23f   : > { %2115 = vmatprep.subr.mxu0 %v2628_v1 }
 0x241   : > { %v918_v28 = vpop.permute.xlu0 %917 }
 0x242   : > { %2108 = vmatmul.mubr.msk.f32.vlgmr.msra.gmra.mrb[4].mxu0 %vm754_vm2, %v918_v28 }
 0x243   : > { %2117 = vmatprep.mubr.msk.f32.mxu0 %vm2627_vm0, %v2628_v1  ;;  %2116 = vmatpush3.msra.mxu0 %v751_v52 }
 0x244   : > { %2125 = vmatprep.subr.mxu0 %v2628_v1 }
 0x2a1   : > { %v827_v31 = vpop.f32.mrb[2].mxu1 }
 0x2a2   : > { %v831_v32 = vmul.f32 0.35355338, %v827_v31  ;;  %v2099_v33 = vpop.f32.mrb[3].mxu1 }
 0x2a4   : > { %v832_v34 = vsel %vm754_vm2, %v831_v32, -inf }
 0x2a5   : > { %833 = vmax.xlane.f32.xlu1 %v832_v34 }
 0x315   : > { %v991_v35 = vpop.f32.mrb[4].mxu0 }
 0x316   : > { %v995_v36 = vmul.f32 0.35355338, %v991_v35  ;;  %v2109_v37 = vpop.f32.mrb[5].mxu0  ;;  %v753_v35 = vld [vmem:[#allocation13 + $0x18] sm:$0xff] }
 0x318   : > { %v996_v38 = vsel %vm754_vm2, %v995_v36, -inf }
 0x319   : > { %997 = vmax.xlane.f32.xlu1 %v996_v38 }
 0x332   : > { %v834_v39 = vpop.xlane.xlu1 %833 }
 0x333   : > { %v835_v40 = vsub.f32 %v831_v32, %v834_v39 }
 0x335   : > { %v836_v41 = vmul.f32 1.442695, %v835_v40 }
 0x337   : > { %2285 = vpow2.f32 %v836_v41 }
 0x341   : > { %v2286_v42 = vpop.eup %2285 }
 0x342   : > { %v838_v43 = vsel %vm754_vm2, %v2286_v42, 0.0 }
 0x343   : > { %839 = vadd.xlane.f32.xlu0 %v838_v43 }
 0x359   : > { %1324 = vrot.lane.b32.xlu0 %v3040_v29, %s2630_s23 }
 0x35d   : > { %1476 = vrot.lane.b32.xlu0 %v669_v23, %s2631_s18 }
 0x3a6   : > { %v998_v44 = vpop.xlane.xlu1 %997 }
 0x3a7   : > { %v999_v45 = vsub.f32 %v995_v36, %v998_v44 }
 0x3a9   : > { %v1000_v46 = vmul.f32 1.442695, %v999_v45 }
 0x3ab   : > { %2287 = vpow2.f32 %v1000_v46 }
 0x3b5   : > { %v2288_v47 = vpop.eup %2287 }
 0x3b6   : > { %v1002_v48 = vsel %vm754_vm2, %v2288_v47, 0.0 }
 0x3b7   : > { %1003 = vadd.xlane.f32.xlu1 %v1002_v48 }
 0x3c8   : > { %1010 = vrot.lane.b32.xlu1 %v3040_v29, %s2629_s11 }
 0x3cc   : > { %1234 = vrot.lane.b32.xlu1 %v669_v23, %s2630_s23 }
 0x3d0   : > { %v840_v49 = vpop.xlane.xlu0 %839  ;;  %1232 = vrot.lane.b32.xlu1 %v3026_v25, %s2630_s23 }
 0x3d1   : > { %2289 = vrcp.f32 %v840_v49 }
 0x3d4   : > { %v1325_v59 = vpop.permute.xlu0 %1324 }
 0x3d8   : > { %v1477_v17 = vpop.permute.xlu0 %1476 }
 0x3db   : > { %v2290_v50 = vpop.eup %2289 }
 0x3dc   : > { %v842_v51 = vmul.f32 %v2290_v50, %v2286_v42 }
 0x3de   : > { %843 = vst.msk [vmem:[%s3054_s1] sm:$0xff] %vm754_vm2, %v842_v51  ;;  %2103 = vmatmul.mubr.msk.f32.vlgmr.msra.gmra.mrb[4].mxu1 %vm754_vm2, %v842_v51 }
 0x3df   : > { %2112 = vmatprep.mubr.msk.f32.mxu1 %vm2627_vm0, %v2628_v1 }
 0x444   : > { %v1004_v53 = vpop.xlane.xlu1 %1003 }
 0x445   : > { %2291 = vrcp.f32 %v1004_v53 }
 0x448   : > { %v1011_v54 = vpop.permute.xlu1 %1010 }
 0x449   : > { %2111 = vmatpush3.msra.mxu1 %v1011_v54 }
 0x44a   : > { %2120 = vmatprep.subr.mxu1 %v2628_v1 }
 0x44c   : > { %v1235_v61 = vpop.permute.xlu1 %1234 }
 0x44f   : > { %v2292_v55 = vpop.eup %2291 }
 0x450   : > { %v1006_v56 = vmul.f32 %v2292_v55, %v2288_v47  ;;  %v1233_v0 = vpop.permute.xlu1 %1232 }
 0x452   : > { %1999 = vst.msk [vmem:[%s3054_s1 + $0x8] sm:$0xff] %vm754_vm2, %v1006_v56  ;;  %2113 = vmatmul.mubr.msk.f32.vlgmr.msra.gmra.mrb[6].mxu1 %vm754_vm2, %v1006_v56 }
 0x453   : > { %2121 = vmatpush3.msra.mxu1 %v750_v57  ;;  %2122 = vmatprep.mubr.msk.f32.mxu1 %vm2627_vm0, %v2628_v1 }
 0x454   : > { %2130 = vmatprep.subr.mxu1 %v2628_v1 }
 0x4b1   : > { %v913_v58 = vpop.f32.mrb[4].mxu1 }
 0x4b2   : > { %v2104_v60 = vpop.f32.mrb[5].mxu1  ;;  %2123 = vmatmul.mubr.msk.f32.vlgmr.msra.gmra.mrb[8].mxu1 %vm754_vm2, %v913_v58 }
 0x4b3   : > { %2131 = vmatpush3.msra.mxu1 %v1325_v59  ;;  %2132 = vmatprep.mubr.msk.f32.mxu1 %vm2627_vm0, %v2628_v1 }
 0x4b4   : > { %2140 = vmatprep.subr.mxu1 %v2628_v1 }
 0x525   : > { %v1082_v62 = vpop.f32.mrb[6].mxu1 }
 0x526   : > { %v2114_v63 = vpop.f32.mrb[7].mxu1  ;;  %2118 = vmatmul.mubr.msk.f32.vlgmr.msra.gmra.mrb[6].mxu0 %vm754_vm2, %v1082_v62 }
 0x527   : > { %2126 = vmatpush3.xpose.msk.msra.mxu0 %vm754_vm2, %v1235_v61  ;;  %2127 = vmatprep.mubr.msk.f32.mxu0 %vm2627_vm0, %v2628_v1 }
 0x528   : > { %2135 = vmatprep.subr.mxu0 %v2628_v1 }
 0x52a   : > { %2128 = vmatmul.mubr.msk.f32.vlgmr.msra.gmra.mrb[8].mxu0 %vm754_vm2, %v1233_v0 }
 0x52b   : > { %2137 = vmatprep.mubr.msk.f32.mxu0 %vm2627_vm0, %v2628_v1  ;;  %2136 = vmatpush3.msra.mxu0 %v752_v22 }
 0x52c   : > { %2145 = vmatprep.subr.mxu0 %v2628_v1 }
 0x585   : > { %v1228_v2 = vpop.f32.mrb[8].mxu1 }
 0x586   : > { %v2124_v3 = vpop.f32.mrb[9].mxu1 }
 0x5f9   : > { %v1155_v4 = vpop.f32.mrb[6].mxu0 }
 0x5fa   : > { %v1229_v5 = vadd.f32 %v1228_v2, %v1155_v4  ;;  %v2119_v6 = vpop.f32.mrb[7].mxu0 }
 0x5fd   : > { %v1306_v7 = vpop.f32.mrb[8].mxu0 }
 0x5fe   : > { %v1310_v8 = vmul.f32 0.35355338, %v1306_v7  ;;  %v2129_v9 = vpop.f32.mrb[9].mxu0 }
 0x600   : > { %v1311_v10 = vsel %vm754_vm2, %v1310_v8, -inf }
 0x601   : > { %1312 = vmax.xlane.f32.xlu1 %v1311_v10 }
 0x68e   : > { %v1313_v11 = vpop.xlane.xlu1 %1312 }
 0x68f   : > { %v1314_v12 = vsub.f32 %v1310_v8, %v1313_v11 }
 0x691   : > { %v1315_v13 = vmul.f32 1.442695, %v1314_v12 }
 0x693   : > { %2293 = vpow2.f32 %v1315_v13 }
 0x69d   : > { %v2294_v14 = vpop.eup %2293 }
 0x69e   : > { %v1317_v16 = vsel %vm754_vm2, %v2294_v14, 0.0 }
 0x69f   : > { %1318 = vadd.xlane.f32.xlu0 %v1317_v16 }
 0x6b5   : > { %1474 = vrot.lane.b32.xlu0 %v3026_v25, %s2631_s18 }
 0x72c   : > { %v1319_v18 = vpop.xlane.xlu0 %1318 }
 0x72d   : > { %2295 = vrcp.f32 %v1319_v18 }
 0x730   : > { %v1475_v21 = vpop.permute.xlu0 %1474 }
 0x737   : > { %v2296_v19 = vpop.eup %2295 }
 0x738   : > { %v1321_v20 = vmul.f32 %v2296_v19, %v2294_v14 }
 0x73a   : > { %2005 = vst.msk [vmem:[%s3054_s1 + $0x10] sm:$0xff] %vm754_vm2, %v1321_v20  ;;  %2133 = vmatmul.mubr.msk.f32.vlgmr.msra.gmra.mrb[10].mxu1 %vm754_vm2, %v1321_v20 }
 0x73b   : > { %2141 = vmatpush3.xpose.msk.msra.mxu1 %vm754_vm2, %v1477_v17  ;;  %2142 = vmatprep.mubr.msk.f32.mxu1 %vm2627_vm0, %v2628_v1 }
 0x73c   : > { %2150 = vmatprep.subr.mxu1 %v2628_v1 }
 0x73e   : > { %2143 = vmatmul.mubr.msk.f32.vlgmr.msra.gmra.mrb[12].mxu1 %vm754_vm2, %v1475_v21 }
 0x73f   : > { %2152 = vmatprep.mubr.msk.f32.mxu1 %vm2627_vm0, %v2628_v1  ;;  %2151 = vmatpush3.msra.mxu1 %v753_v35 }
 0x80d   : > { %v1396_v23 = vpop.f32.mrb[10].mxu1 }
 0x80e   : > { %v2134_v24 = vpop.f32.mrb[11].mxu1  ;;  %2138 = vmatmul.mubr.msk.f32.vlgmr.msra.gmra.mrb[10].mxu0 %vm754_vm2, %v1396_v23 }
 0x80f   : > { %2147 = vmatprep.mubr.msk.f32.mxu0 %vm2627_vm0, %v2628_v1 }
 0x811   : > { %v1548_v25 = vpop.f32.mrb[12].mxu1 }
 0x812   : > { %v1552_v26 = vmul.f32 0.35355338, %v1548_v25  ;;  %v2144_v27 = vpop.f32.mrb[13].mxu1 }
 0x814   : > { %v1553_v28 = vsel %vm754_vm2, %v1552_v26, -inf }
 0x815   : > { %1554 = vmax.xlane.f32.xlu0 %v1553_v28 }
 0x8a2   : > { %v1555_v30 = vpop.xlane.xlu0 %1554 }
 0x8a3   : > { %v1556_v31 = vsub.f32 %v1552_v26, %v1555_v30 }
 0x8a5   : > { %v1557_v32 = vmul.f32 1.442695, %v1556_v31 }
 0x8a7   : > { %2297 = vpow2.f32 %v1557_v32 }
 0x8b1   : > { %v2298_v33 = vpop.eup %2297 }
 0x8b2   : > { %v1559_v34 = vsel %vm754_vm2, %v2298_v33, 0.0 }
 0x8b3   : > { %1560 = vadd.xlane.f32.xlu1 %v1559_v34 }
 0x8c4   : > { %1566 = vrot.lane.b32.xlu1 %v3040_v29, %s2631_s18 }
 0x8e1   : > { %v1469_v1 = vpop.f32.mrb[10].mxu0 }
 0x8e2   : > { %v1473_v36 = vadd.f32 %v1469_v1, %v1229_v5  ;;  %v2139_v37 = vpop.f32.mrb[11].mxu0 }
 0x940   : > { %v1561_v38 = vpop.xlane.xlu1 %1560 }
 0x941   : > { %2299 = vrcp.f32 %v1561_v38 }
 0x944   : > { %v1567_v39 = vpop.permute.xlu1 %1566 }
 0x945   : > { %2146 = vmatpush3.msra.mxu0 %v1567_v39 }
 0x94b   : > { %v2300_v40 = vpop.eup %2299 }
 0x94c   : > { %v1563_v41 = vmul.f32 %v2300_v40, %v2298_v33 }
 0x94e   : > { %2010 = vst.msk [vmem:[%s3054_s1 + $0x18] sm:$0xff] %vm754_vm2, %v1563_v41  ;;  %2148 = vmatmul.mubr.msk.f32.vlgmr.msra.gmra.mrb[12].mxu0 %vm754_vm2, %v1563_v41 }
 0xa21   : > { %v1638_v42 = vpop.f32.mrb[12].mxu0 }
 0xa22   : > { %v2149_v43 = vpop.f32.mrb[13].mxu0  ;;  %2153 = vmatmul.mubr.msk.f32.vlgmr.msra.gmra.mrb[14].mxu1 %vm754_vm2, %v1638_v42 }
 0xaf5   : > { %v1711_v29 = vpop.f32.mrb[14].mxu1 }
 0xaf6   : > { %v1715_v44 = vadd.f32 %v1711_v29, %v1473_v36  ;;  %v2154_v45 = vpop.f32.mrb[15].mxu1 }
 0xaf8   : > { %v1716_v46 = vadd.f32 %v1715_v44, %v3008_v15 }
 0xafa   : > { %v1717_v47 = vsel %vm522_vm1, %v1716_v46, 0.0 }
 0xafb   : > { %1718 = vadd.xlane.f32.xlu1 %v1717_v47 }
 0xb88   : > { %v1719_v48 = vpop.xlane.xlu1 %1718 }
 0xb89   : > { %v1721_v49 = vmul.f32 0.03125, %v1719_v48 }
 0xb8b   : > { %v1722_v50 = vsub.f32 %v1716_v46, %v1721_v49 }
 0xb8d   : > { %v1723_v51 = vmul.f32 %v1722_v50, %v1722_v50 }
 0xb8f   : > { %v1724_v52 = vsel %vm522_vm1, %v1723_v51, 0.0 }
 0xb90   : > { %1725 = vadd.xlane.f32.xlu0 %v1724_v52 }
 0xb91   : > { %2518 = shalt.err (!%p2515_p4)
}
 0xb92   : > { %s2519_s20 = scalar_lea.hbm %s3115_s9, 512  ;;  %s2523_s29 = scalar_lea.hbm %s3272_s28, 1024 }
 0xb93   : > { %p2520_p10 = scmp.ne.s32.totalorder %s3115_s9, %s2519_s20  ;;  %p2524_p12 = scmp.lt.u32.totalorder %s3115_s9, %s3272_s28 }
 0xb94   : > { %p2525_p0 = scmp.lt.u32.totalorder %s2523_s29, %s2519_s20  ;;  %p2527_p9 = scmp.lt.u32.totalorder %s2519_s20, %s3115_s9 }
 0xb95   : > { %p2521_p3 = pnand %p2520_p10, %p3273_p13 }
 0xb96   : > { %p2526_p7 = por %p2525_p0, %p2524_p12 }
 0xb97   : > { %p2522_p8 = pneg %p2521_p3 }
 0xb98   : > { %p2528_p11 = por %p2527_p9, %p2526_p7 }
 0xb9a   : > { %p2529_p1 = pnand %p2528_p11, %p2522_p8 }
 0xb9c   : > { %2532 = shalt.err (!%p2529_p1)
}
 0xb9d   : > { %s2633_s18 = smov 128   ;;  %s2634_s25 = smov 8  }
 0xb9e   : > { %2196 = dma.vmem_to_hbm [thread:$0]  (%p3273_p13), %s3117_s5, 512, %s3115_s9, %s1756_s24, %s2633_s18, %s2633_s18, %s2634_s25  }
 0xb9f   : > { %s3274_s22 = sld [smem:[#allocation31_spill]]  ;;  %s3275_s13 = sld [smem:[#allocation32_spill]] }
 0xba0   : > { %s2017_s30 = sshll.u32 %s2712_s19, 7  ;;  %s507_s8 = scalar_lea.vmem [#allocation14], %s2977_s7 }
 0xba1   : > { %s1769_s5 = sshll.u32 %s507_s8, 4  ;;  %s3276_s10 = sld [smem:[#allocation33_spill]]  ;;  %s3156_s5 = int_to_ptr.vmem [resolvable:$true] %s1769_s5 }
 0xba2   : > { %s1751_s26 = scalar_lea.sflag [#allocation4], %s2974_s17  ;;  %s2533_s27 = scalar_lea.vmem %s3156_s5, 128 }
 0xba3   : > { %p2534_p6 = scmp.ne.s32.totalorder %s3156_s5, %s2533_s27  ;;  %s2635_s19 = smov [#allocation14]  }
 0xba4   : > { %s2537_s7 = sshll.u32 %s2635_s19, 4  ;;  %s2538_s7 = int_to_ptr.vmem [resolvable:$false] %s2537_s7 }
 0xba5   : > { %v2013_v55 = vld [vmem:[%s3274_s22] ss:$0 sm:$0xff]  ;;  %p2535_p5 = pnand %p2534_p6, %p3273_p13  ;;  %s2539_s29 = scalar_lea.vmem %s2538_s7, 256 }
 0xba6   : > { %v2014_v58 = vld [vmem:[%s3275_s13] ss:$0 sm:$0xff]  ;;  %p2540_p4 = scmp.lt.s32.totalorder %s3156_s5, %s2538_s7  ;;  %p2541_p10 = scmp.lt.s32.totalorder %s2539_s29, %s2533_s27 }
 0xba7   : > { %s3154_s20 = scalar_lea.hbm %s3276_s10, %s2017_s30  ;;  %p2536_p2 = pneg %p2535_p5 }
 0xba8   : > { %p2542_p3 = por %p2541_p10, %p2540_p4 }
 0xbaa   : > { %p2543_p8 = pnand %p2542_p3, %p2536_p2 }
 0xc1d   : > { %v1726_v15 = vpop.xlane.xlu0 %1725 }
 0xc1e   : > { %v1727_v53 = vmul.f32 0.03125, %v1726_v15 }
 0xc20   : > { %v1728_v54 = vadd.f32 1e-05, %v1727_v53 }
 0xc22   : > { %2301 = vrsqrt.f32 %v1728_v54 }
 0xc2c   : > { %v2302_v56 = vpop.eup %2301 }
 0xc2d   : > { %v1737_v57 = vmul.f32 %v2302_v56, %v2013_v55 }
 0xc2f   : > { %v1739_v59 = vmul.f32 %v1737_v57, %v1721_v49  ;;  %v1747_v60 = vmul.f32 %v1737_v57, %v1716_v46 }
 0xc31   : > { %v1746_v61 = vsub.f32 %v2014_v58, %v1739_v59 }
 0xc33   : > { %v1748_v62 = vadd.f32 %v1747_v60, %v1746_v61 }
 0xc35   : > { %1749 = vst.msk [vmem:[%s507_s8] sm:$0xff] %vm522_vm1, %v1748_v62 }
 0xc36   : > { %2546 = shalt.err (!%p2543_p8)
}
 0xc37   : > { %s2547_s17 = scalar_lea.hbm %s3154_s20, 128  ;;  %s2551_s18 = scalar_lea.hbm %s3276_s10, 256 }
 0xc38   : > { %p2548_p12 = scmp.ne.s32.totalorder %s3154_s20, %s2547_s17  ;;  %p2552_p9 = scmp.lt.u32.totalorder %s3154_s20, %s3276_s10 }
 0xc39   : > { %p2553_p11 = scmp.lt.u32.totalorder %s2551_s18, %s2547_s17  ;;  %p2555_p6 = scmp.lt.u32.totalorder %s2547_s17, %s3154_s20 }
 0xc3a   : > { %p2549_p0 = pnand %p2548_p12, %p3273_p13 }
 0xc3b   : > { %p2554_p1 = por %p2553_p11, %p2552_p9 }
 0xc3c   : > { %p2550_p7 = pneg %p2549_p0 }
 0xc3d   : > { %p2556_p5 = por %p2555_p6, %p2554_p1 }
 0xc3f   : > { %p2557_p2 = pnand %p2556_p5, %p2550_p7 }
 0xc41   : > { %2560 = shalt.err (!%p2557_p2)
}
 0xc42   : > { %2195 = dma.vmem_to_hbm [thread:$0]  (%p3273_p13), %s3156_s5, 128, %s3154_s20, %s1751_s26  }
 0xc43 PF: > { %s3277_s3 = sld [smem:[#allocation23_spill]]  ;;  %s3278_s22 = sld [smem:[#allocation27_spill]] }
 0xc44   : > { %s3279_s21 = sld [smem:[#allocation24_spill]] }
 0xc49   : > { %s1797_s16 = sand.u32 1, %s3277_s3   ;;  %p3280_p4 = scmp.ne.s32.totalorder %s3278_s22, 0 }
 0xc4a   : > { %p3281_p10 = scmp.ge.s32.totalorder %s3279_s21, 2  ;;  %s1798_s13 = scalar_lea.sflag [#allocation4], %s1797_s16 }
 0xc4c   : > { %p2223_p3 = pnand %p3281_p10, %p3280_p4 }
 0xc4e   : > { %2594 = dma.done.wait (!%p2223_p3), %s1798_s13, 128  }
 0xc4f   : > { %2596 = vsyncadd (!%p2223_p3), %s1798_s13, 4294967168  ;;  %s1807_s30 = scalar_lea.sflag [#allocation16], %s1797_s16 }
 0xc50   : > { %2598 = dma.done.wait (!%p2223_p3), %s1807_s30, 512  }
 0xc51   : > { %2600 = vsyncadd (!%p2223_p3), %s1807_s30, 4294966784  ;;  %s3282_s16 = sld [smem:[#allocation25_spill]]  ;;  %s3283_s12 = sld [smem:[#allocation26_spill]] }
 0xc52   : > { %s3284_s13 = smov %s2607_s14  ;;  %s3285_s14 = smov %s2611_s15 }
 0xc57   : > { %p32_p13 = scmp.ge.s32.totalorder %s3282_s16, 4   ;;  %s3286_s15 = smov %s3283_s12 }
 0xc59   :  { %34 = sbr.rel (!%p32_p13) target bundleno = 19 (0x13), region = 161 }
 0xc60   :  { %1812 = vsyncpa [#allocation3], 1 }
 0xc61   :  { %1814 = vsyncpa [#allocation3 + $0x1], 1 }
 0xc62   :  { %1815 = vsyncpa [#allocation6], 1 }
 0xc63   :  { %1817 = vsyncpa [#allocation6 + $0x1], 1 }
 0xc64   :  { %1818 = vsyncpa [#allocation9], 1 }
 0xc65   :  { %1819 = vsyncpa [#allocation12], 1 }
 0xc66   :  { %1820 = vsyncpa [#allocation4], 1 }
 0xc67   :  { %1822 = vsyncpa [#allocation4 + $0x1], 1 }
 0xc68   :  { %1823 = vsyncpa [#allocation16], 1 }
 0xc69   :  { %1825 = vsyncpa [#allocation16 + $0x1], 1 }

</bundles_post_ra>
